<compile_context>
chip_gen: v6e
topology: v6e:2x2x1
jax: 0.10.0
libtpu: 0.0.40
codegen_flags: <defaults>
</compile_context>

<pallas_src>
import numpy as np

import jax
import jax.numpy as jnp
from jax.experimental import pallas as pl
from jax.experimental.pallas import tpu as pltpu

NUM_BOND_TYPE = 6
NUM_BOND_DIRECTION = 3
NUM_ATOM_TYPE = 120
NUM_CHIRALITY_TAG = 3
NUM_HYBRIDIZATION_TYPE = 6
BN_EPS = 1e-5

EDGE_FEAT = NUM_BOND_TYPE + NUM_BOND_DIRECTION   # 9
EDGE_FEAT_PAD = 16                               # pad contraction dim for clean layout
LANE = 128                                       # TPU lane width


def _round_up(x, m):
    return (x + m - 1) // m * m


# ----------------------------- Pallas kernel --------------------------------
def fused_gin_kernel(adj_ref, h0_ref, eagg_ref, w1_ref, w2_ref, bias_ref,
                     out_ref, h_scr):
    """One grid step == one GIN layer. h is carried in a bf16 VMEM scratch."""
    l = pl.program_id(0)
    nl = pl.num_programs(0)
    dp = out_ref.shape[1]

    # Initialize the carry from the input node embedding on the first layer.
    @pl.when(l == 0)
    def _():
        h_scr[...] = h0_ref[...]

    # Message + 'add' aggregation + per-destination edge-embedding sum:
    #   agg[i] = sum_{e: dst_e==i} h[src_e] + eagg_l[i]
    agg = jnp.dot(adj_ref[...], h_scr[...],
                  preferred_element_type=jnp.float32) + eagg_ref[...]

    b1 = bias_ref[0:1, :]            # [1, Hp]
    b2 = bias_ref[1:2, 0:dp]         # [1, Dp] (BN folded)

    # GIN MLP: Linear(D,2D) -> ReLU -> Linear(2D,D) (BN folded into w2/b2).
    h1 = jnp.dot(agg.astype(jnp.bfloat16), w1_ref[...],
                 preferred_element_type=jnp.float32) + b1
    h1 = jnp.maximum(h1, 0.0)
    h2 = jnp.dot(h1.astype(jnp.bfloat16), w2_ref[...],
                 preferred_element_type=jnp.float32) + b2

    # ReLU on all but the last layer (eval-mode dropout == identity); the f32
    # output tile is emitted only on the final layer.
    @pl.when(l != nl - 1)
    def _():
        h_scr[...] = jnp.maximum(h2, 0.0).astype(jnp.bfloat16)

    @pl.when(l == nl - 1)
    def _():
        out_ref[...] = h2


# ------------------------------ parameters ----------------------------------
def _xavier(key, shape):
    fan_in, fan_out = shape[0], shape[1]
    limit = (6.0 / (fan_in + fan_out)) ** 0.5
    return jax.random.uniform(key, shape, jnp.float32, -limit, limit)


def init_params(key, num_layer, emb_dim):
    def nk(i):
        return jax.random.fold_in(key, i)

    params = {
        "x_emb1": _xavier(nk(0), (NUM_ATOM_TYPE, emb_dim)),
        "x_emb2": _xavier(nk(1), (NUM_CHIRALITY_TAG, emb_dim)),
        "x_emb3": _xavier(nk(2), (NUM_HYBRIDIZATION_TYPE, emb_dim)),
        "layers": [],
    }
    for l in range(num_layer):
        base = 100 * (l + 1)
        lp = {
            # torch Linear stores [out, in]; kept pre-transposed as [in, out]
            "w1": _xavier(nk(base + 0), (emb_dim, 2 * emb_dim)),
            "b1": 0.01 * jax.random.normal(nk(base + 1), (1, 2 * emb_dim), jnp.float32),
            "w2": _xavier(nk(base + 2), (2 * emb_dim, emb_dim)),
            "b2": 0.01 * jax.random.normal(nk(base + 3), (1, emb_dim), jnp.float32),
            "edge_emb1": _xavier(nk(base + 4), (NUM_BOND_TYPE, emb_dim)),
            "edge_emb2": _xavier(nk(base + 5), (NUM_BOND_DIRECTION, emb_dim)),
            # BatchNorm1d params / running stats
            "gamma": jnp.ones((1, emb_dim), jnp.float32),
            "beta": jnp.zeros((1, emb_dim), jnp.float32),
            "mean": jnp.zeros((1, emb_dim), jnp.float32),
            "var": jnp.ones((1, emb_dim), jnp.float32),
        }
        params["layers"].append(lp)
    return params


# ---------------- one-time parameter packing (hoisted out of the call path) --
def prepare_packed_params(params):
    """Pad/stack per-layer weights, fold eval BatchNorm into w2/b2, cast to bf16.

    Run ONCE and cache; the per-call forward only does graph-dependent prep.
    """
    layers = params["layers"]
    D = params["x_emb1"].shape[1]
    H = layers[0]["w1"].shape[1]                     # 2*D
    Dp = max(_round_up(D, LANE), LANE)
    Hp = max(_round_up(H, LANE), LANE)

    w1_s, w2_s, bias_s, ee_s = [], [], [], []
    for lp in layers:
        scale = lp["gamma"][0] * jax.lax.rsqrt(lp["var"][0] + BN_EPS)      # [D]
        w1 = jnp.zeros((Dp, Hp), jnp.float32).at[:D, :H].set(lp["w1"])
        w2f = lp["w2"] * scale[None, :]
        b2f = (lp["b2"][0] - lp["mean"][0]) * scale + lp["beta"][0]
        w2 = jnp.zeros((Hp, Dp), jnp.float32).at[:H, :D].set(w2f)
        bias = jnp.zeros((2, Hp), jnp.float32)
        bias = bias.at[0, :H].set(lp["b1"][0])       # row 0: b1
        bias = bias.at[1, :D].set(b2f)               # row 1: b2 (BN folded)
        ee = jnp.concatenate([lp["edge_emb1"], lp["edge_emb2"]], axis=0)   # [9, D]
        eep = jnp.zeros((EDGE_FEAT_PAD, Dp), jnp.float32).at[:EDGE_FEAT, :D].set(ee)
        w1_s.append(w1); w2_s.append(w2); bias_s.append(bias); ee_s.append(eep)

    return {
        "x_emb1": params["x_emb1"],
        "x_emb2": params["x_emb2"],
        "x_emb3": params["x_emb3"],
        "w1": jnp.stack(w1_s).astype(jnp.bfloat16),   # [L, Dp, Hp]
        "w2": jnp.stack(w2_s).astype(jnp.bfloat16),   # [L, Hp, Dp]  (BN folded)
        "bias": jnp.stack(bias_s),                    # [L, 2, Hp]   f32
        "ee": jnp.stack(ee_s),                        # [L, 16, Dp]  f32
    }


# --------------------- forward: graph prep (XLA) + fused kernel --------------
def _add_self_loops(N, edge_index, edge_attr):
    sl = jnp.arange(N, dtype=edge_index.dtype)
    ei = jnp.concatenate([edge_index, jnp.stack([sl, sl])], axis=1)
    loop_attr = jnp.concatenate(
        [jnp.full((N, 1), 4, edge_attr.dtype), jnp.zeros((N, 1), edge_attr.dtype)], axis=1)
    ea = jnp.concatenate([edge_attr, loop_attr], axis=0)
    return ei, ea


def gnn_node_encoder_forward(packed, x_nodes, edge_index, edge_attr):
    """GIN node encoder forward (JK='last') via one fused Pallas kernel."""
    L = packed["w1"].shape[0]
    Dp = packed["w1"].shape[1]
    Hp = packed["w1"].shape[2]
    D = packed["x_emb1"].shape[1]
    N = x_nodes.shape[0]
    Np = max(_round_up(N, LANE), LANE)               # MXU M dim / sublane padding

    ei, ea = _add_self_loops(N, edge_index, edge_attr)
    src, dst = ei[0], ei[1]

    # Input node embedding, zero-padded to [Np, Dp]; stored bf16 (same value the
    # kernel would feed the MXU after casting).
    h0 = (packed["x_emb1"][x_nodes[:, 0]]
          + packed["x_emb2"][x_nodes[:, 1]]
          + packed["x_emb3"][x_nodes[:, 2]]).astype(jnp.float32)
    h0p = jnp.zeros((Np, Dp), jnp.float32).at[:N, :D].set(h0).astype(jnp.bfloat16)

    # Dense adjacency with edge multiplicities: A[dst, src] += 1 (exact in bf16).
    adj = jnp.zeros((Np, Np), jnp.float32).at[dst, src].add(1.0).astype(jnp.bfloat16)

    # Layer-invariant per-destination bond-type/direction count matrix, then
    # per-layer per-node edge-embedding aggregate, precomputed once in f32 and
    # streamed into the kernel (replaces the in-kernel K=16 matmul).
    c1 = jnp.zeros((Np, NUM_BOND_TYPE), jnp.float32).at[dst, ea[:, 0]].add(1.0)
    c2 = jnp.zeros((Np, NUM_BOND_DIRECTION), jnp.float32).at[dst, ea[:, 1]].add(1.0)
    cmat = jnp.zeros((Np, EDGE_FEAT_PAD), jnp.float32)
    cmat = cmat.at[:, :EDGE_FEAT].set(jnp.concatenate([c1, c2], axis=1))
    eagg = jnp.einsum("nk,lkd->lnd", cmat, packed["ee"])            # [L, Np, Dp] f32

    out = pl.pallas_call(
        fused_gin_kernel,
        grid=(L,),
        in_specs=[
            # resident across layers (constant block index -> DMA'd once)
            pl.BlockSpec((Np, Np), lambda l: (0, 0)),                # adj   bf16
            pl.BlockSpec((Np, Dp), lambda l: (0, 0)),                # h0    bf16
            # streamed per layer (auto double-buffered)
            pl.BlockSpec((None, Np, Dp), lambda l: (l, 0, 0)),       # eagg  f32
            pl.BlockSpec((None, Dp, Hp), lambda l: (l, 0, 0)),       # w1    bf16
            pl.BlockSpec((None, Hp, Dp), lambda l: (l, 0, 0)),       # w2    bf16 (BN folded)
            pl.BlockSpec((None, 2, Hp), lambda l: (l, 0, 0)),        # [b1; b2] f32
        ],
        out_specs=pl.BlockSpec((Np, Dp), lambda l: (0, 0)),          # final h (f32)
        out_shape=jax.ShapeDtypeStruct((Np, Dp), jnp.float32),
        scratch_shapes=[pltpu.VMEM((Np, Dp), jnp.bfloat16)],         # h carry
        compiler_params=pltpu.CompilerParams(
            dimension_semantics=("arbitrary",),      # layer axis carries state
        ),
    )(adj, h0p, eagg, packed["w1"], packed["w2"], packed["bias"])

    return out[:N, :D]                               # JK == 'last'


# ------------------------- NodeEncodeInterface wrapper -----------------------
def build_batch_dict(batch_vec):
    """Python-dict grouping of node indices per graph id (as in the PyTorch module)."""
    d = {}
    for i, v in enumerate(np.asarray(batch_vec).tolist()):
        d.setdefault(int(v), []).append(i)
    return d


def node_encode_interface_forward(packed, x_nodes, edge_index, edge_attr, batch_vec):
    node_representation = gnn_node_encoder_forward(packed, x_nodes, edge_index, edge_attr)
    return node_representation, build_batch_dict(batch_vec)


# ------------------------------ pure-JAX reference ---------------------------
def gnn_node_encoder_reference(params, x_nodes, edge_index, edge_attr, *, bf16_matmuls=False):
    """bf16_matmuls=False: faithful f32 PyTorch-style math.
       bf16_matmuls=True : mirrors the kernel's bf16-carry / BN-folded math."""
    layers = params["layers"]
    N = x_nodes.shape[0]
    D = params["x_emb1"].shape[1]
    ei, ea = _add_self_loops(N, edge_index, edge_attr)
    src, dst = ei[0], ei[1]

    h = (params["x_emb1"][x_nodes[:, 0]]
         + params["x_emb2"][x_nodes[:, 1]]
         + params["x_emb3"][x_nodes[:, 2]]).astype(jnp.float32)
    adj = jnp.zeros((N, N), jnp.float32).at[dst, src].add(1.0)

    c1 = jnp.zeros((N, NUM_BOND_TYPE), jnp.float32).at[dst, ea[:, 0]].add(1.0)
    c2 = jnp.zeros((N, NUM_BOND_DIRECTION), jnp.float32).at[dst, ea[:, 1]].add(1.0)
    cmat = jnp.concatenate([c1, c2], axis=1)

    for li, lp in enumerate(layers):
        scale = lp["gamma"][0] * jax.lax.rsqrt(lp["var"][0] + BN_EPS)
        eemb_tab = jnp.concatenate([lp["edge_emb1"], lp["edge_emb2"]], axis=0)
        if bf16_matmuls:
            eagg = jnp.dot(cmat, eemb_tab)                                   # f32
            agg = jnp.dot(adj.astype(jnp.bfloat16), h.astype(jnp.bfloat16),
                          preferred_element_type=jnp.float32) + eagg
            h1 = jnp.maximum(jnp.dot(agg.astype(jnp.bfloat16),
                                     lp["w1"].astype(jnp.bfloat16),
                                     preferred_element_type=jnp.float32) + lp["b1"], 0.0)
            w2f = (lp["w2"] * scale[None, :]).astype(jnp.bfloat16)
            b2f = (lp["b2"][0] - lp["mean"][0]) * scale + lp["beta"][0]
            y = jnp.dot(h1.astype(jnp.bfloat16), w2f,
                        preferred_element_type=jnp.float32) + b2f[None, :]
            if li != len(layers) - 1:
                # kernel carries the post-ReLU activation in bf16
                y = jnp.maximum(y, 0.0).astype(jnp.bfloat16).astype(jnp.float32)
        else:
            edge_emb = (lp["edge_emb1"][ea[:, 0]] + lp["edge_emb2"][ea[:, 1]]).astype(jnp.float32)
            eagg = jnp.zeros((N, D), jnp.float32).at[dst].add(edge_emb)
            agg = adj @ h + eagg
            h1 = jnp.maximum(agg @ lp["w1"] + lp["b1"], 0.0)
            h2 = h1 @ lp["w2"] + lp["b2"]
            y = (h2 - lp["mean"]) * jax.lax.rsqrt(lp["var"] + BN_EPS) * lp["gamma"] + lp["beta"]
            if li != len(layers) - 1:
                y = jnp.maximum(y, 0.0)
        h = y
    return h


# --------------------------------- main --------------------------------------
if __name__ == "__main__":
    key = jax.random.PRNGKey(0)
    num_layer = 3
    emb_dim = 32
    N = 16    # nodes (already the packed batch of graphs, as in PyG)
    E = 24    # directed edges (before self-loops)

    params = init_params(jax.random.fold_in(key, 7), num_layer, emb_dim)
    # One-time parameter packing (padding / stacking / BN folding / bf16 cast),
    # cached outside the per-call path.
    packed = jax.tree_util.tree_map(jax.block_until_ready, prepare_packed_params(params))

    k1, k2, k3, k4, k5 = jax.random.split(key, 5)
    x_nodes = jnp.stack(
        [jax.random.randint(k1, (N,), 0, NUM_ATOM_TYPE),
         jax.random.randint(k2, (N,), 0, NUM_CHIRALITY_TAG),
         jax.random.randint(k3, (N,), 0, NUM_HYBRIDIZATION_TYPE)], axis=1).astype(jnp.int32)
    edge_index = jax.random.randint(k4, (2, E), 0, N, dtype=jnp.int32)
    edge_attr = jnp.stack(
        [jax.random.randint(k5, (E,), 0, NUM_BOND_TYPE),
         jax.random.randint(jax.random.fold_in(k5, 1), (E,), 0, NUM_BOND_DIRECTION)],
        axis=1).astype(jnp.int32)
    batch_vec = jnp.concatenate(
        [jnp.zeros((N // 2,), jnp.int32), jnp.ones((N - N // 2,), jnp.int32)])

    fwd = jax.jit(gnn_node_encoder_forward)
    out = jax.block_until_ready(fwd(packed, x_nodes, edge_index, edge_attr))
    node_repr, batch_dict = node_encode_interface_forward(
        packed, x_nodes, edge_index, edge_attr, batch_vec)
    node_repr = jax.block_until_ready(node_repr)

    # Kernel-correctness check: pure-JAX reference with identical bf16/BN-folded math.
    ref_match = jax.block_until_ready(
        gnn_node_encoder_reference(params, x_nodes, edge_index, edge_attr, bf16_matmuls=True))
    # Semantic sanity check vs. the faithful f32 reference (bf16 drift bound).
    ref_f32 = jax.block_until_ready(
        gnn_node_encoder_reference(params, x_nodes, edge_index, edge_attr, bf16_matmuls=False))

    assert out.shape == (N, emb_dim) and out.dtype == jnp.float32
    assert jnp.allclose(out, ref_match, atol=5e-3, rtol=5e-3), \
        "Pallas output mismatch vs bf16-matched JAX reference"
    assert float(jnp.max(jnp.abs(out - ref_f32))) < 0.15, \
        "Pallas output drifts too far from f32 reference"
    assert batch_dict == {0: list(range(N // 2)), 1: list(range(N // 2, N))}
    print("KERNEL_OK")
</pallas_src>

<mosaic_0001>
module attributes {stable_mosaic.version = 11 : i64} {
  func.func private @main(%arg0: i32) attributes {dimension_semantics = [#tpu.dimension_semantics<core_parallel>], iteration_bounds = array<i64: 2>, tpu.core_type = #tpu.core_type<sc_scalar_subcore>, window_params = []} {
    return
  }
}

module attributes {stable_mosaic.version = 11 : i64} {
  func.func private @main(%arg0: i32) attributes {dimension_semantics = [#tpu.dimension_semantics<core_parallel>], iteration_bounds = array<i64: 2>, tpu.core_type = #tpu.core_type<sc_scalar_subcore>, window_params = []} {
    return
  }
}

module attributes {stable_mosaic.version = 11 : i64} {
  func.func @fused_gin_kernel(%arg0: i32, %arg1: memref<128x128xbf16, #tpu.memory_space<vmem>>, %arg2: memref<128x128xbf16, #tpu.memory_space<vmem>>, %arg3: memref<1x128x128xf32, #tpu.memory_space<vmem>>, %arg4: memref<1x128x128xbf16, #tpu.memory_space<vmem>>, %arg5: memref<1x128x128xbf16, #tpu.memory_space<vmem>>, %arg6: memref<1x2x128xf32, #tpu.memory_space<vmem>>, %arg7: memref<128x128xf32, #tpu.memory_space<vmem>>, %arg8: memref<128x128xbf16, #tpu.memory_space<vmem>>) attributes {dimension_semantics = [#tpu.dimension_semantics<arbitrary>], iteration_bounds = array<i64: 3>, scalar_prefetch = 0 : i64, scratch_operands = 1 : i64, tpu.core_type = #tpu.core_type<tc>, window_params = [{pipeline_mode = #tpu.pipeline_mode<synchronous>, transform_indices = @transform_0, window_bounds = array<i64: 128, 128>}, {pipeline_mode = #tpu.pipeline_mode<synchronous>, transform_indices = @transform_1, window_bounds = array<i64: 128, 128>}, {transform_indices = @transform_2, window_bounds = array<i64: 1, 128, 128>}, {transform_indices = @transform_3, window_bounds = array<i64: 1, 128, 128>}, {transform_indices = @transform_4, window_bounds = array<i64: 1, 128, 128>}, {transform_indices = @transform_5, window_bounds = array<i64: 1, 2, 128>}, {pipeline_mode = #tpu.pipeline_mode<synchronous>, transform_indices = @transform_6, window_bounds = array<i64: 128, 128>}]} {
    %c0_i32 = arith.constant 0 : i32
    %0 = arith.cmpi eq, %arg0, %c0_i32 : i32
    %1 = arith.extui %0 : i1 to i32
    %c0_i32_0 = arith.constant 0 : i32
    %2 = arith.cmpi ne, %1, %c0_i32_0 : i32
    scf.if %2 {
      %c0_24 = arith.constant 0 : index
      %c0_25 = arith.constant 0 : index
      %33 = vector.load %arg2[%c0_24, %c0_25] : memref<128x128xbf16, #tpu.memory_space<vmem>>, vector<128x128xbf16>
      %c0_26 = arith.constant 0 : index
      %c0_27 = arith.constant 0 : index
      %34 = vector.load %arg8[%c0_26, %c0_27] : memref<128x128xbf16, #tpu.memory_space<vmem>>, vector<128x128xbf16>
      tpu.vector_store %arg8[%c0_26, %c0_27], %33 {strides = array<i32>} : memref<128x128xbf16, #tpu.memory_space<vmem>>, vector<128x128xbf16>,
    } else {
    }
    %c0 = arith.constant 0 : index
    %c0_1 = arith.constant 0 : index
    %3 = vector.load %arg1[%c0, %c0_1] : memref<128x128xbf16, #tpu.memory_space<vmem>>, vector<128x128xbf16>
    %c0_2 = arith.constant 0 : index
    %c0_3 = arith.constant 0 : index
    %4 = vector.load %arg8[%c0_2, %c0_3] : memref<128x128xbf16, #tpu.memory_space<vmem>>, vector<128x128xbf16>
    %cst = arith.constant dense<0.000000e+00> : vector<128x128xf32>
    %5 = tpu.matmul %3, %4, %cst {dimension_numbers = #tpu.dot_dimension_numbers<[1], [0], [0], [1], [0, 0, 1, 1], [], []>} : vector<128x128xbf16>, vector<128x128xbf16>, vector<128x128xf32> -> vector<128x128xf32>
    %c0_4 = arith.constant 0 : index
    %c0_5 = arith.constant 0 : index
    %c0_6 = arith.constant 0 : index
    %6 = vector.load %arg3[%c0_4, %c0_5, %c0_6] : memref<1x128x128xf32, #tpu.memory_space<vmem>>, vector<1x128x128xf32>
    %7 = vector.shape_cast %6 : vector<1x128x128xf32> to vector<128x128xf32>
    %8 = arith.addf %5, %7 : vector<128x128xf32>
    %c0_7 = arith.constant 0 : index
    %c0_8 = arith.constant 0 : index
    %c0_9 = arith.constant 0 : index
    %9 = vector.load %arg6[%c0_7, %c0_8, %c0_9] : memref<1x2x128xf32, #tpu.memory_space<vmem>>, vector<1x1x128xf32>
    %10 = vector.shape_cast %9 : vector<1x1x128xf32> to vector<1x128xf32>
    %c0_10 = arith.constant 0 : index
    %c1 = arith.constant 1 : index
    %c0_11 = arith.constant 0 : index
    %11 = vector.load %arg6[%c0_10, %c1, %c0_11] : memref<1x2x128xf32, #tpu.memory_space<vmem>>, vector<1x1x128xf32>
    %12 = vector.shape_cast %11 : vector<1x1x128xf32> to vector<1x128xf32>
    %13 = arith.truncf %8 : vector<128x128xf32> to vector<128x128xbf16>
    %c0_12 = arith.constant 0 : index
    %c0_13 = arith.constant 0 : index
    %c0_14 = arith.constant 0 : index
    %14 = vector.load %arg4[%c0_12, %c0_13, %c0_14] : memref<1x128x128xbf16, #tpu.memory_space<vmem>>, vector<1x128x128xbf16>
    %15 = vector.shape_cast %14 : vector<1x128x128xbf16> to vector<128x128xbf16>
    %cst_15 = arith.constant dense<0.000000e+00> : vector<128x128xf32>
    %16 = tpu.matmul %13, %15, %cst_15 {dimension_numbers = #tpu.dot_dimension_numbers<[1], [0], [0], [1], [0, 0, 1, 1], [], []>} : vector<128x128xbf16>, vector<128x128xbf16>, vector<128x128xf32> -> vector<128x128xf32>
    %17 = vector.broadcast %10 : vector<1x128xf32> to vector<128x128xf32>
    %18 = arith.addf %16, %17 : vector<128x128xf32>
    %cst_16 = arith.constant 0.000000e+00 : f32
    %19 = vector.broadcast %cst_16 : f32 to vector<128x128xf32>
    %20 = arith.maximumf %18, %19 : vector<128x128xf32>
    %21 = arith.truncf %20 : vector<128x128xf32> to vector<128x128xbf16>
    %c0_17 = arith.constant 0 : index
    %c0_18 = arith.constant 0 : index
    %c0_19 = arith.constant 0 : index
    %22 = vector.load %arg5[%c0_17, %c0_18, %c0_19] : memref<1x128x128xbf16, #tpu.memory_space<vmem>>, vector<1x128x128xbf16>
    %23 = vector.shape_cast %22 : vector<1x128x128xbf16> to vector<128x128xbf16>
    %cst_20 = arith.constant dense<0.000000e+00> : vector<128x128xf32>
    %24 = tpu.matmul %21, %23, %cst_20 {dimension_numbers = #tpu.dot_dimension_numbers<[1], [0], [0], [1], [0, 0, 1, 1], [], []>} : vector<128x128xbf16>, vector<128x128xbf16>, vector<128x128xf32> -> vector<128x128xf32>
    %25 = vector.broadcast %12 : vector<1x128xf32> to vector<128x128xf32>
    %26 = arith.addf %24, %25 : vector<128x128xf32>
    %c2_i32 = arith.constant 2 : i32
    %27 = arith.cmpi ne, %arg0, %c2_i32 : i32
    %28 = arith.extui %27 : i1 to i32
    %c0_i32_21 = arith.constant 0 : i32
    %29 = arith.cmpi ne, %28, %c0_i32_21 : i32
    scf.if %29 {
      %cst_24 = arith.constant 0.000000e+00 : f32
      %33 = vector.broadcast %cst_24 : f32 to vector<128x128xf32>
      %34 = arith.maximumf %26, %33 : vector<128x128xf32>
      %35 = arith.truncf %34 : vector<128x128xf32> to vector<128x128xbf16>
      %c0_25 = arith.constant 0 : index
      %c0_26 = arith.constant 0 : index
      %36 = vector.load %arg8[%c0_25, %c0_26] : memref<128x128xbf16, #tpu.memory_space<vmem>>, vector<128x128xbf16>
      tpu.vector_store %arg8[%c0_25, %c0_26], %35 {strides = array<i32>} : memref<128x128xbf16, #tpu.memory_space<vmem>>, vector<128x128xbf16>,
    } else {
    }
    %c2_i32_22 = arith.constant 2 : i32
    %30 = arith.cmpi eq, %arg0, %c2_i32_22 : i32
    %31 = arith.extui %30 : i1 to i32
    %c0_i32_23 = arith.constant 0 : i32
    %32 = arith.cmpi ne, %31, %c0_i32_23 : i32
    scf.if %32 {
      %c0_24 = arith.constant 0 : index
      %c0_25 = arith.constant 0 : index
      %33 = vector.load %arg7[%c0_24, %c0_25] : memref<128x128xf32, #tpu.memory_space<vmem>>, vector<128x128xf32>
      tpu.vector_store %arg7[%c0_24, %c0_25], %26 {strides = array<i32>} : memref<128x128xf32, #tpu.memory_space<vmem>>, vector<128x128xf32>,
    } else {
    }
    return
  }
  func.func @transform_0(%arg0: i32) -> (i32, i32) {
    %c0_i32 = arith.constant 0 : i32
    %c0_i32_0 = arith.constant 0 : i32
    %c0_i32_1 = arith.constant 0 : i32
    return %c0_i32, %c0_i32_0 : i32, i32
  }
  func.func @transform_1(%arg0: i32) -> (i32, i32) {
    %c0_i32 = arith.constant 0 : i32
    %c0_i32_0 = arith.constant 0 : i32
    %c0_i32_1 = arith.constant 0 : i32
    return %c0_i32, %c0_i32_0 : i32, i32
  }
  func.func @transform_2(%arg0: i32) -> (i32, i32, i32) {
    %c0_i32 = arith.constant 0 : i32
    %c0_i32_0 = arith.constant 0 : i32
    %c0_i32_1 = arith.constant 0 : i32
    return %arg0, %c0_i32, %c0_i32_0 : i32, i32, i32
  }
  func.func @transform_3(%arg0: i32) -> (i32, i32, i32) {
    %c0_i32 = arith.constant 0 : i32
    %c0_i32_0 = arith.constant 0 : i32
    %c0_i32_1 = arith.constant 0 : i32
    return %arg0, %c0_i32, %c0_i32_0 : i32, i32, i32
  }
  func.func @transform_4(%arg0: i32) -> (i32, i32, i32) {
    %c0_i32 = arith.constant 0 : i32
    %c0_i32_0 = arith.constant 0 : i32
    %c0_i32_1 = arith.constant 0 : i32
    return %arg0, %c0_i32, %c0_i32_0 : i32, i32, i32
  }
  func.func @transform_5(%arg0: i32) -> (i32, i32, i32) {
    %c0_i32 = arith.constant 0 : i32
    %c0_i32_0 = arith.constant 0 : i32
    %c0_i32_1 = arith.constant 0 : i32
    return %arg0, %c0_i32, %c0_i32_0 : i32, i32, i32
  }
  func.func @transform_6(%arg0: i32) -> (i32, i32) {
    %c0_i32 = arith.constant 0 : i32
    %c0_i32_0 = arith.constant 0 : i32
    %c0_i32_1 = arith.constant 0 : i32
    return %c0_i32, %c0_i32_0 : i32, i32
  }
}

</mosaic_0001>

<bundles_post_ra>
// kernel: gnn_node_encoder_forward.1
= control target key start
LH: loop header
LB: loop body
LE: loop exit
PB: predicated region body
PF: predicated region fallthrough
CT: control target
= control target key end

     0   :  { %s1495_s21 = smov 0   ;;  %s1685_s0 = inlined_call_operand.vmem [shape: bf16[128,128], index: 0, kind: input, shape index: {}]   ;;  %s1686_s1 = inlined_call_operand.vmem [shape: bf16[128,128], index: 1, kind: input, shape index: {}]   ;;  %s1687_s2 = inlined_call_operand.vmem [shape: f32[3,128,128], index: 2, kind: input, shape index: {}]   ;;  %s1688_s3 = inlined_call_operand.vmem [shape: bf16[3,128,128], index: 3, kind: input, shape index: {}]   ;;  %s1689_s4 = inlined_call_operand.vmem [shape: bf16[3,128,128], index: 4, kind: input, shape index: {}]   ;;  %s1690_s5 = inlined_call_operand.vmem [shape: f32[3,2,128], index: 5, kind: input, shape index: {}]   ;;  %s1691_s6 = inlined_call_operand.vmem [shape: f32[128,128], index: 6, kind: output, shape index: {}]  }
   0x1 LB: > { %s1501_s22 = sadd.s32 4294967295, %s1458_s21   ;;  %p1123_p0 = scmp.ge.s32.totalorder %s1458_s21, 1  ;;  %s1458_s21 = sphi %s1495_s21, %s16_s21  }
   0x2   : > { %p236_p1 = scmp.lt.s32.totalorder %s1458_s21, 4 }
   0x4   : > { %p237_p2 = pnand %p1123_p0, %p236_p1 }
   0x5   : > { %p275_p3 = scmp.lt.s32.totalorder (!%p237_p2), %s1501_s22, 2  ;;  %p1131_p4 = scmp.ne.s32.totalorder (!%p237_p2), %s1501_s22, 0 }
   0x6   : > { %240 = sbr.rel (%p237_p2) target bundleno = 720 (0x2d0), region = 44 }
   0xb   : > { %s276_s23 = scalar_select %p275_p3, %s1501_s22, 2 }
   0xc   : > { %298 = sbr.rel (%p1131_p4) target bundleno = 22 (0x16), region = 48 }
   0xd   : > { %s1186_s24 = sshll.u32 %s276_s23, 7  ;;  %s1187_s25 = sshll.u32 %s276_s23, 6 }
   0xe   : > { %s1510_s28 = scalar_lea.vmem %s1687_s2, %s1186_s24  ;;  %s1515_s7 = scalar_lea.vmem %s1688_s3, %s1187_s25 }
   0xf   : > { %s1520_s10 = scalar_lea.vmem %s1689_s4, %s1187_s25  ;;  %s1130_s11 = sshll.u32 %s276_s23, 1 }
  0x10   : > { %s1525_s14 = scalar_lea.vmem %s1690_s5, %s1130_s11 }
  0x11   : > { %v299_v0 = vld [vmem:[%s1686_s1] sm:$0xff]   ;;  %v301_v1 = vld [vmem:[%s1686_s1 + $0x8] sm:$0xff]   ;;  %v303_v2 = vld [vmem:[%s1686_s1 + $0x10] sm:$0xff]  }
  0x12   : > { %315 = vst [vmem:[#allocation2] sm:$0xff] %v299_v0   ;;  %317 = vst [vmem:[#allocation2 + $0x8] sm:$0xff] %v301_v1   ;;  %v305_v3 = vld [vmem:[%s1686_s1 + $0x18] sm:$0xff]   ;;  %v307_v4 = vld [vmem:[%s1686_s1 + $0x20] sm:$0xff]  }
  0x13   : > { %319 = vst [vmem:[#allocation2 + $0x10] sm:$0xff] %v303_v2   ;;  %v309_v5 = vld [vmem:[%s1686_s1 + $0x28] sm:$0xff]   ;;  %321 = vst [vmem:[#allocation2 + $0x18] sm:$0xff] %v305_v3   ;;  %v311_v6 = vld [vmem:[%s1686_s1 + $0x30] sm:$0xff]  }
  0x14   : > { %323 = vst [vmem:[#allocation2 + $0x20] sm:$0xff] %v307_v4   ;;  %325 = vst [vmem:[#allocation2 + $0x28] sm:$0xff] %v309_v5   ;;  %v313_v7 = vld [vmem:[%s1686_s1 + $0x38] sm:$0xff]  }
  0x15   : > { %327 = vst [vmem:[#allocation2 + $0x30] sm:$0xff] %v311_v6   ;;  %329 = vst [vmem:[#allocation2 + $0x38] sm:$0xff] %v313_v7  }
  0x16 PF: > { %v1428_v12 = vld [vmem:[%s1685_s0] sm:$0xff]   ;;  %v1436_v15 = vld [vmem:[%s1515_s7 + $0x38] sm:$0xff]   ;;  %v1437_v16 = vld [vmem:[%s1515_s7 + $0x30] sm:$0xff]   ;;  %p1166_p5 = scmp.eq.s32.totalorder %s1501_s22, 2 }
  0x17   : > { %1316 = vmatprep.mubr.bf16.mxu0 %v1428_v12  ;;  %1332 = vmatprep.subr.bf16.mxu1 %v1436_v15  ;;  %v1438_v18 = vld [vmem:[%s1515_s7 + $0x28] sm:$0xff]   ;;  %v1439_v20 = vld [vmem:[%s1515_s7 + $0x20] sm:$0xff]   ;;  %v1440_v21 = vld [vmem:[%s1515_s7 + $0x18] sm:$0xff]  }
  0x18   : > { %1333 = vmatpush3.bf16.msra.mxu1 %v1436_v15  ;;  %v1429_v22 = vld [vmem:[%s1685_s0 + $0x8] sm:$0xff]   ;;  %v1430_v23 = vld [vmem:[%s1685_s0 + $0x10] sm:$0xff]   ;;  %v1431_v24 = vld [vmem:[%s1685_s0 + $0x18] sm:$0xff]  }
  0x19   : > { %v1426_v17 = vld [vmem:[#allocation2 + $0x8] sm:$0xff]   ;;  %1334 = vmatprep.subr.bf16.mxu1 %v1437_v16  ;;  %v1427_v19 = vld [vmem:[#allocation2] sm:$0xff]   ;;  %v1434_v27 = vld [vmem:[%s1685_s0 + $0x30] sm:$0xff]  }
  0x1a   : > { %v1424_v13 = vld [vmem:[#allocation2 + $0x18] sm:$0xff]   ;;  %v1425_v14 = vld [vmem:[#allocation2 + $0x10] sm:$0xff]   ;;  %v1432_v25 = vld [vmem:[%s1685_s0 + $0x20] sm:$0xff]  }
  0x1b   : > { %v1422_v10 = vld [vmem:[#allocation2 + $0x28] sm:$0xff]   ;;  %v1423_v11 = vld [vmem:[#allocation2 + $0x20] sm:$0xff]   ;;  %v1435_v28 = vld [vmem:[%s1685_s0 + $0x38] sm:$0xff]  }
  0x1c   : > { %v1420_v8 = vld [vmem:[#allocation2 + $0x38] sm:$0xff]   ;;  %v1421_v9 = vld [vmem:[#allocation2 + $0x30] sm:$0xff]   ;;  %1335 = vmatpush3.bf16.msra.mxu1 %v1437_v16  ;;  %v1433_v26 = vld [vmem:[%s1685_s0 + $0x28] sm:$0xff]  }
  0x1d   : > { %1300 = vmatprep.subr.bf16.mxu0 %v1420_v8  ;;  %1336 = vmatprep.subr.bf16.mxu1 %v1438_v18  ;;  %v1441_v29 = vld [vmem:[%s1515_s7 + $0x10] sm:$0xff]   ;;  %v1442_v30 = vld [vmem:[%s1515_s7 + $0x8] sm:$0xff]   ;;  %v1443_v31 = vld [vmem:[%s1515_s7] sm:$0xff]  }
  0x1e   : > { %1301 = vmatpush3.bf16.msra.mxu0 %v1420_v8  ;;  %v1444_v32 = vld [vmem:[%s1520_s10 + $0x38] sm:$0xff]   ;;  %v1445_v33 = vld [vmem:[%s1520_s10 + $0x30] sm:$0xff]   ;;  %v1446_v34 = vld [vmem:[%s1520_s10 + $0x28] sm:$0xff]  }
  0x1f   : > { %1302 = vmatprep.subr.bf16.mxu0 %v1421_v9  ;;  %v1447_v35 = vld [vmem:[%s1520_s10 + $0x20] sm:$0xff]   ;;  %v1589_v36 = vld [vmem:[%s1520_s10 + $0x18] sm:$0xff]   ;;  %v364_v42 = vld [vmem:[%s1510_s28 + $0x8] sm:$0xff] }
  0x20   : > { %1337 = vmatpush3.bf16.msra.mxu1 %v1438_v18  ;;  %v366_v39 = vld [vmem:[%s1510_s28 + $0x18] sm:$0xff]  ;;  %v363_v40 = vld [vmem:[%s1510_s28] sm:$0xff]  ;;  %v365_v43 = vld [vmem:[%s1510_s28 + $0x10] sm:$0xff] }
  0x21   : > { %1338 = vmatprep.subr.bf16.mxu1 %v1439_v20  ;;  %v370_v53 = vld [vmem:[%s1510_s28 + $0x38] sm:$0xff]  ;;  %v367_v54 = vld [vmem:[%s1510_s28 + $0x20] sm:$0xff]  ;;  %v368_v56 = vld [vmem:[%s1510_s28 + $0x28] sm:$0xff] }
  0x22   : > { %1303 = vmatpush3.bf16.msra.mxu0 %v1421_v9  ;;  %v369_v57 = vld [vmem:[%s1510_s28 + $0x30] sm:$0xff]  ;;  %v374_v3 = vld [vmem:[%s1510_s28 + $0x58] sm:$0xff]  ;;  %v371_v4 = vld [vmem:[%s1510_s28 + $0x40] sm:$0xff] }
  0x23   : > { %1304 = vmatprep.subr.bf16.mxu0 %v1422_v10  ;;  %v372_v6 = vld [vmem:[%s1510_s28 + $0x48] sm:$0xff]  ;;  %v373_v7 = vld [vmem:[%s1510_s28 + $0x50] sm:$0xff]  ;;  %v375_v18 = vld [vmem:[%s1510_s28 + $0x60] sm:$0xff] }
  0x24   : > { %1339 = vmatpush3.bf16.msra.mxu1 %v1439_v20  ;;  %v376_v20 = vld [vmem:[%s1510_s28 + $0x68] sm:$0xff] }
  0x25   : > { %1340 = vmatprep.subr.bf16.mxu1 %v1440_v21 }
  0x26   : > { %1305 = vmatpush3.bf16.msra.mxu0 %v1422_v10 }
  0x27   : > { %1306 = vmatprep.subr.bf16.mxu0 %v1423_v11 }
  0x28   : > { %1341 = vmatpush3.bf16.msra.mxu1 %v1440_v21  ;;  %v377_v21 = vld [vmem:[%s1510_s28 + $0x70] sm:$0xff] }
  0x29   : > { %1342 = vmatprep.subr.bf16.mxu1 %v1441_v29 }
  0x2a   : > { %1307 = vmatpush3.bf16.msra.mxu0 %v1423_v11 }
  0x2b   : > { %1308 = vmatprep.subr.bf16.mxu0 %v1424_v13 }
  0x2c   : > { %1343 = vmatpush3.bf16.msra.mxu1 %v1441_v29  ;;  %v1449_v29 = vld [vmem:[%s1520_s10 + $0x10] sm:$0xff]  }
  0x2d   : > { %1344 = vmatprep.subr.bf16.mxu1 %v1442_v30 }
  0x2e   : > { %1309 = vmatpush3.bf16.msra.mxu0 %v1424_v13 }
  0x2f   : > { %1310 = vmatprep.subr.bf16.mxu0 %v1425_v14 }
  0x30   : > { %1345 = vmatpush3.bf16.msra.mxu1 %v1442_v30  ;;  %v1450_v30 = vld [vmem:[%s1520_s10 + $0x8] sm:$0xff]  }
  0x31   : > { %1346 = vmatprep.subr.bf16.mxu1 %v1443_v31 }
  0x32   : > { %1311 = vmatpush3.bf16.msra.mxu0 %v1425_v14 }
  0x33   : > { %1312 = vmatprep.subr.bf16.mxu0 %v1426_v17 }
  0x34   : > { %1347 = vmatpush3.bf16.msra.mxu1 %v1443_v31  ;;  %v1451_v31 = vld [vmem:[%s1520_s10] sm:$0xff]  }
  0x35   : > { %1396 = vmatprep.subr.bf16.mxu1 %v1444_v32 }
  0x36   : > { %1313 = vmatpush3.bf16.msra.mxu0 %v1426_v17  ;;  %v378_v17 = vld [vmem:[%s1510_s28 + $0x78] sm:$0xff] }
  0x37   : > { %1314 = vmatprep.subr.bf16.mxu0 %v1427_v19 }
  0x3a   : > { %1315 = vmatpush3.bf16.msra.mxu0 %v1427_v19 }
  0x3b   : > { %1364 = vmatprep.subr.bf16.mxu0 %v1444_v32 }
  0x3d   : > { %1317 = vmatmul.mubr.bf16.vlgmr.msra.gmra.mxu0 %v1429_v22 }
  0x3e   : > { %1320 = vmatprep.mubr.bf16.mxu0 %v1430_v23  ;;  %1365 = vmatpush3.bf16.msra.mxu0 %v1444_v32 }
  0x3f   : > { %1366 = vmatprep.subr.bf16.mxu0 %v1445_v33 }
  0x42   : > { %1367 = vmatpush3.bf16.msra.mxu0 %v1445_v33 }
  0x43   : > { %1368 = vmatprep.subr.bf16.mxu0 %v1446_v34 }
  0x45   : > { %1321 = vmatmul.mubr.bf16.gmra.mxu0 %v1431_v24 }
  0x46   : > { %1324 = vmatprep.mubr.bf16.mxu0 %v1432_v25  ;;  %1369 = vmatpush3.bf16.msra.mxu0 %v1446_v34 }
  0x47   : > { %1370 = vmatprep.subr.bf16.mxu0 %v1447_v35 }
  0x4a   : > { %1371 = vmatpush3.bf16.msra.mxu0 %v1447_v35 }
  0x4b   : > { %1372 = vmatprep.subr.bf16.mxu0 %v1589_v36 }
  0x4d   : > { %1325 = vmatmul.mubr.bf16.gmra.mxu0 %v1433_v26 }
  0x4e   : > { %1328 = vmatprep.mubr.bf16.mxu0 %v1434_v27  ;;  %1373 = vmatpush3.bf16.msra.mxu0 %v1589_v36 }
  0x4f   : > { %1374 = vmatprep.subr.bf16.mxu0 %v1449_v29 }
  0x52   : > { %1375 = vmatpush3.bf16.msra.mxu0 %v1449_v29 }
  0x53   : > { %1376 = vmatprep.subr.bf16.mxu0 %v1450_v30 }
  0x55   : > { %1329 = vmatmul.mubr.bf16.gmra.mxu0 %v1435_v28 }
  0x56   : > { %1377 = vmatpush3.bf16.msra.mxu0 %v1450_v30 }
  0x57   : > { %1378 = vmatprep.subr.bf16.mxu0 %v1451_v31 }
  0x5a   : > { %1379 = vmatpush3.bf16.msra.mxu0 %v1451_v31 }
  0xfd   : > { %v1318_v37 = vpop.f32.mrf.mxu0 }
  0xfe   : > { %v518_v48 = vadd.f32 %v1318_v37, %v365_v43 }
  0xff   : > { %v509_v38 = vpop.f32.mrf.mxu0 }
 0x100   : > { %v510_v46 = vadd.f32 %v509_v38, %v363_v40 }
 0x101   : > { %v1319_v41 = vpop.f32.mrf.mxu0 }
 0x102   : > { %v521_v44 = vadd.f32 %v1319_v41, %v366_v39 }
 0x103   : > { %v512_v45 = vpop.f32.mrf.mxu0 }
 0x104   : > { %v513_v47 = vadd.f32 %v512_v45, %v364_v42  ;;  %v575_v51 = vpack.c.bf16 %v521_v44, %v518_v48 }
 0x105   : > { %v1322_v49 = vpop.f32.mrf.mxu0 }
 0x106   : > { %v574_v50 = vpack.c.bf16 %v513_v47, %v510_v46  ;;  %v534_v62 = vadd.f32 %v1322_v49, %v369_v57 }
 0x107   : > { %v525_v52 = vpop.f32.mrf.mxu0 }
 0x108   : > { %1348 = vmatprep.mubr.bf16.mxu1 %v574_v50  ;;  %v526_v60 = vadd.f32 %v525_v52, %v367_v54 }
 0x109   : > { %v1323_v55 = vpop.f32.mrf.mxu0  ;;  %1349 = vmatmul.mubr.bf16.vlgmr.msra.gmra.mxu1 %v575_v51 }
 0x10a   : > { %1404 = vmatpush3.bf16.msra.mxu1 %v1444_v32  ;;  %v537_v58 = vadd.f32 %v1323_v55, %v370_v53 }
 0x10b   : > { %v528_v59 = vpop.f32.mrf.mxu0  ;;  %1397 = vmatprep.subr.bf16.mxu1 %v1445_v33 }
 0x10c   : > { %v529_v61 = vadd.f32 %v528_v59, %v368_v56  ;;  %v577_v1 = vpack.c.bf16 %v537_v58, %v534_v62 }
 0x10d   : > { %v1326_v63 = vpop.f32.mrf.mxu0 }
 0x10e   : > { %v576_v0 = vpack.c.bf16 %v529_v61, %v526_v60  ;;  %1405 = vmatpush3.bf16.msra.mxu1 %v1445_v33  ;;  %v550_v12 = vadd.f32 %v1326_v63, %v373_v7 }
 0x10f   : > { %v541_v2 = vpop.f32.mrf.mxu0  ;;  %1398 = vmatprep.subr.bf16.mxu1 %v1446_v34 }
 0x110   : > { %1352 = vmatprep.mubr.bf16.mxu1 %v576_v0  ;;  %v542_v10 = vadd.f32 %v541_v2, %v371_v4 }
 0x111   : > { %v1327_v5 = vpop.f32.mrf.mxu0  ;;  %1353 = vmatmul.mubr.bf16.gmra.mxu1 %v577_v1 }
 0x112   : > { %1406 = vmatpush3.bf16.msra.mxu1 %v1446_v34  ;;  %v553_v8 = vadd.f32 %v1327_v5, %v374_v3  ;;  %v1148_v34 = vld [vmem:[%s1525_s14] ss:$0 sm:$0xff] }
 0x113   : > { %v544_v9 = vpop.f32.mrf.mxu0  ;;  %1399 = vmatprep.subr.bf16.mxu1 %v1447_v35 }
 0x114   : > { %v545_v11 = vadd.f32 %v544_v9, %v372_v6  ;;  %v579_v15 = vpack.c.bf16 %v553_v8, %v550_v12 }
 0x115   : > { %v1330_v13 = vpop.f32.mrf.mxu0 }
 0x116   : > { %v578_v14 = vpack.c.bf16 %v545_v11, %v542_v10  ;;  %1407 = vmatpush3.bf16.msra.mxu1 %v1447_v35  ;;  %v566_v26 = vadd.f32 %v1330_v13, %v377_v21 }
 0x117   : > { %v557_v16 = vpop.f32.mrf.mxu0  ;;  %1400 = vmatprep.subr.bf16.mxu1 %v1589_v36 }
 0x118   : > { %1356 = vmatprep.mubr.bf16.mxu1 %v578_v14  ;;  %v558_v24 = vadd.f32 %v557_v16, %v375_v18 }
 0x119   : > { %v1331_v19 = vpop.f32.mrf.mxu0  ;;  %1357 = vmatmul.mubr.bf16.gmra.mxu1 %v579_v15 }
 0x11a   : > { %1408 = vmatpush3.bf16.msra.mxu1 %v1589_v36  ;;  %v569_v22 = vadd.f32 %v1331_v19, %v378_v17 }
 0x11b   : > { %v560_v23 = vpop.f32.mrf.mxu0  ;;  %1401 = vmatprep.subr.bf16.mxu1 %v1449_v29 }
 0x11c   : > { %v561_v25 = vadd.f32 %v560_v23, %v376_v20  ;;  %v581_v28 = vpack.c.bf16 %v569_v22, %v566_v26 }
 0x11e   : > { %v580_v27 = vpack.c.bf16 %v561_v25, %v558_v24  ;;  %1409 = vmatpush3.bf16.msra.mxu1 %v1449_v29  ;;  %v1157_v25 = vld [vmem:[%s1525_s14 + $0x1] ss:$0 sm:$0xff] }
 0x11f   : > { %1402 = vmatprep.subr.bf16.mxu1 %v1450_v30 }
 0x120   : > { %1360 = vmatprep.mubr.bf16.mxu1 %v580_v27 }
 0x121   : > { %1361 = vmatmul.mubr.bf16.gmra.mxu1 %v581_v28 }
 0x122   : > { %1410 = vmatpush3.bf16.msra.mxu1 %v1450_v30 }
 0x123   : > { %1403 = vmatprep.subr.bf16.mxu1 %v1451_v31 }
 0x126   : > { %1411 = vmatpush3.bf16.msra.mxu1 %v1451_v31 }
 0x1c9   : > { %v1350_v32 = vpop.f32.mrf.mxu1 }
 0x1ca   : > { %v693_v38 = vadd.f32 %v1350_v32, %v1148_v34 }
 0x1cb   : > { %v684_v33 = vpop.f32.mrf.mxu1 }
 0x1cc   : > { %v685_v36 = vadd.f32 %v1148_v34, %v684_v33  ;;  %v749_v45 = vmax.f32 %v693_v38, 0.0 }
 0x1cd   : > { %v1351_v35 = vpop.f32.mrf.mxu1 }
 0x1ce   : > { %v696_v37 = vadd.f32 %v1351_v35, %v1148_v34  ;;  %v747_v43 = vmax.f32 %v685_v36, 0.0 }
 0x1cf   : > { %v687_v39 = vpop.f32.mrf.mxu1 }
 0x1d0   : > { %v688_v40 = vadd.f32 %v1148_v34, %v687_v39  ;;  %v750_v41 = vmax.f32 %v696_v37, 0.0 }
 0x1d1   : > { %v1354_v42 = vpop.f32.mrf.mxu1 }
 0x1d2   : > { %v748_v44 = vmax.f32 %v688_v40, 0.0  ;;  %v764_v48 = vpack.c.bf16 %v750_v41, %v749_v45  ;;  %v709_v52 = vadd.f32 %v1354_v42, %v1148_v34 }
 0x1d3   : > { %v700_v46 = vpop.f32.mrf.mxu1 }
 0x1d4   : > { %v763_v47 = vpack.c.bf16 %v748_v44, %v747_v43  ;;  %v701_v50 = vadd.f32 %v1148_v34, %v700_v46  ;;  %v753_v59 = vmax.f32 %v709_v52, 0.0 }
 0x1d5   : > { %v1355_v49 = vpop.f32.mrf.mxu1 }
 0x1d6   : > { %v712_v51 = vadd.f32 %v1355_v49, %v1148_v34  ;;  %1380 = vmatprep.mubr.bf16.mxu0 %v763_v47  ;;  %v751_v57 = vmax.f32 %v701_v50, 0.0 }
 0x1d7   : > { %v703_v53 = vpop.f32.mrf.mxu1  ;;  %1381 = vmatmul.mubr.bf16.vlgmr.msra.gmra.mxu0 %v764_v48 }
 0x1d8   : > { %v704_v54 = vadd.f32 %v1148_v34, %v703_v53  ;;  %v754_v55 = vmax.f32 %v712_v51, 0.0 }
 0x1d9   : > { %v1358_v56 = vpop.f32.mrf.mxu1 }
 0x1da   : > { %v752_v58 = vmax.f32 %v704_v54, 0.0  ;;  %v766_v62 = vpack.c.bf16 %v754_v55, %v753_v59  ;;  %v725_v2 = vadd.f32 %v1358_v56, %v1148_v34 }
 0x1db   : > { %v716_v60 = vpop.f32.mrf.mxu1 }
 0x1dc   : > { %v765_v61 = vpack.c.bf16 %v752_v58, %v751_v57  ;;  %v717_v0 = vadd.f32 %v1148_v34, %v716_v60  ;;  %v757_v9 = vmax.f32 %v725_v2, 0.0 }
 0x1dd   : > { %v1359_v63 = vpop.f32.mrf.mxu1 }
 0x1de   : > { %v728_v1 = vadd.f32 %v1359_v63, %v1148_v34  ;;  %1384 = vmatprep.mubr.bf16.mxu0 %v765_v61  ;;  %v755_v7 = vmax.f32 %v717_v0, 0.0 }
 0x1df   : > { %v719_v3 = vpop.f32.mrf.mxu1  ;;  %1385 = vmatmul.mubr.bf16.gmra.mxu0 %v766_v62 }
 0x1e0   : > { %v720_v4 = vadd.f32 %v1148_v34, %v719_v3  ;;  %v758_v5 = vmax.f32 %v728_v1, 0.0 }
 0x1e1   : > { %v1362_v6 = vpop.f32.mrf.mxu1 }
 0x1e2   : > { %v756_v8 = vmax.f32 %v720_v4, 0.0  ;;  %v768_v12 = vpack.c.bf16 %v758_v5, %v757_v9  ;;  %v741_v16 = vadd.f32 %v1362_v6, %v1148_v34 }
 0x1e3   : > { %v732_v10 = vpop.f32.mrf.mxu1 }
 0x1e4   : > { %v767_v11 = vpack.c.bf16 %v756_v8, %v755_v7  ;;  %v733_v14 = vadd.f32 %v1148_v34, %v732_v10  ;;  %v761_v22 = vmax.f32 %v741_v16, 0.0 }
 0x1e5   : > { %v1363_v13 = vpop.f32.mrf.mxu1 }
 0x1e6   : > { %v744_v15 = vadd.f32 %v1363_v13, %v1148_v34  ;;  %1388 = vmatprep.mubr.bf16.mxu1 %v767_v11  ;;  %v759_v20 = vmax.f32 %v733_v14, 0.0 }
 0x1e7   : > { %v735_v17 = vpop.f32.mrf.mxu1  ;;  %1389 = vmatmul.mubr.bf16.vlgmr.msra.gmra.mxu1 %v768_v12 }
 0x1e8   : > { %v736_v18 = vadd.f32 %v1148_v34, %v735_v17  ;;  %v762_v19 = vmax.f32 %v744_v15, 0.0 }
 0x1ea   : > { %v760_v21 = vmax.f32 %v736_v18, 0.0  ;;  %v770_v24 = vpack.c.bf16 %v762_v19, %v761_v22 }
 0x1ec   : > { %v769_v23 = vpack.c.bf16 %v760_v21, %v759_v20 }
 0x1ee   : > { %1392 = vmatprep.mubr.bf16.mxu1 %v769_v23 }
 0x1ef   : > { %1393 = vmatmul.mubr.bf16.gmra.mxu1 %v770_v24 }
 0x297   : > { %v1382_v26 = vpop.f32.mrf.mxu0 }
 0x298   : > { %v1616_v27 = vadd.f32 %v1382_v26, %v1157_v25 }
 0x299   : > { %v873_v28 = vpop.f32.mrf.mxu0 }
 0x29a   : > { %v1618_v29 = vadd.f32 %v1157_v25, %v873_v28 }
 0x29b   : > { %v1383_v30 = vpop.f32.mrf.mxu0 }
 0x29c   : > { %v1620_v31 = vadd.f32 %v1383_v30, %v1157_v25 }
 0x29d   : > { %v876_v32 = vpop.f32.mrf.mxu0 }
 0x29e   : > { %v877_v33 = vadd.f32 %v1157_v25, %v876_v32 }
 0x29f   : > { %v1386_v34 = vpop.f32.mrf.mxu0 }
 0x2a0   : > { %v1622_v35 = vadd.f32 %v1386_v34, %v1157_v25 }
 0x2a1   : > { %v889_v36 = vpop.f32.mrf.mxu0 }
 0x2a2   : > { %v890_v37 = vadd.f32 %v1157_v25, %v889_v36 }
 0x2a3   : > { %v1387_v38 = vpop.f32.mrf.mxu0 }
 0x2a4   : > { %v901_v39 = vadd.f32 %v1387_v38, %v1157_v25 }
 0x2a5   : > { %v892_v40 = vpop.f32.mrf.mxu0 }
 0x2a6   : > { %v893_v41 = vadd.f32 %v1157_v25, %v892_v40 }
 0x2a7   : > { %v1390_v42 = vpop.f32.mrf.mxu1 }
 0x2a8   : > { %v914_v43 = vadd.f32 %v1390_v42, %v1157_v25 }
 0x2a9   : > { %v905_v44 = vpop.f32.mrf.mxu1 }
 0x2aa   : > { %v906_v45 = vadd.f32 %v1157_v25, %v905_v44 }
 0x2ab   : > { %v1391_v46 = vpop.f32.mrf.mxu1 }
 0x2ac   : > { %v917_v47 = vadd.f32 %v1391_v46, %v1157_v25 }
 0x2ad   : > { %v908_v48 = vpop.f32.mrf.mxu1 }
 0x2ae   : > { %v909_v49 = vadd.f32 %v1157_v25, %v908_v48 }
 0x2af   : > { %v1394_v50 = vpop.f32.mrf.mxu1 }
 0x2b0   : > { %v930_v51 = vadd.f32 %v1394_v50, %v1157_v25 }
 0x2b1   : > { %v921_v52 = vpop.f32.mrf.mxu1 }
 0x2b2   : > { %v922_v53 = vadd.f32 %v1157_v25, %v921_v52  ;;  %939 = sbr.rel (%p1166_p5) target bundleno = 705 (0x2c1), region = 52 }
 0x2b3   : > { %v1395_v54 = vpop.f32.mrf.mxu1 }
 0x2b4   : > { %v933_v55 = vadd.f32 %v1395_v54, %v1157_v25 }
 0x2b5   : > { %v924_v56 = vpop.f32.mrf.mxu1 }
 0x2b6   : > { %v925_v57 = vadd.f32 %v1157_v25, %v924_v56 }
 0x2b7   : > { %v940_v58 = vmax.f32 %v1618_v29, 0.0  ;;  %v941_v59 = vmax.f32 %v877_v33, 0.0  ;;  %v942_v60 = vmax.f32 %v1616_v27, 0.0  ;;  %v943_v61 = vmax.f32 %v1620_v31, 0.0 }
 0x2b8   : > { %v944_v62 = vmax.f32 %v890_v37, 0.0  ;;  %v945_v63 = vmax.f32 %v893_v41, 0.0  ;;  %v946_v0 = vmax.f32 %v1622_v35, 0.0  ;;  %v947_v1 = vmax.f32 %v901_v39, 0.0 }
 0x2b9   : > { %v1208_v2 = vpack.c.bf16 %v941_v59, %v940_v58  ;;  %v1213_v3 = vpack.c.bf16 %v943_v61, %v942_v60  ;;  %v948_v4 = vmax.f32 %v906_v45, 0.0  ;;  %v949_v5 = vmax.f32 %v909_v49, 0.0 }
 0x2ba   : > { %v1218_v6 = vpack.c.bf16 %v945_v63, %v944_v62  ;;  %v1223_v7 = vpack.c.bf16 %v947_v1, %v946_v0  ;;  %v950_v8 = vmax.f32 %v914_v43, 0.0  ;;  %v951_v9 = vmax.f32 %v917_v47, 0.0 }
 0x2bb   : > { %1209 = vst [vmem:[#allocation2] sm:$0xff] %v1208_v2   ;;  %1245 = vst [vmem:[#allocation2 + $0x8] sm:$0xff] %v1213_v3   ;;  %v1228_v10 = vpack.c.bf16 %v949_v5, %v948_v4  ;;  %v952_v11 = vmax.f32 %v922_v53, 0.0  ;;  %v953_v12 = vmax.f32 %v925_v57, 0.0  ;;  %v954_v13 = vmax.f32 %v930_v51, 0.0 }
 0x2bc   : > { %1246 = vst [vmem:[#allocation2 + $0x10] sm:$0xff] %v1218_v6   ;;  %1247 = vst [vmem:[#allocation2 + $0x18] sm:$0xff] %v1223_v7   ;;  %v1233_v14 = vpack.c.bf16 %v951_v9, %v950_v8  ;;  %v955_v15 = vmax.f32 %v933_v55, 0.0 }
 0x2bd   : > { %1248 = vst [vmem:[#allocation2 + $0x20] sm:$0xff] %v1228_v10   ;;  %v1238_v16 = vpack.c.bf16 %v953_v12, %v952_v11 }
 0x2be   : > { %1249 = vst [vmem:[#allocation2 + $0x28] sm:$0xff] %v1233_v14   ;;  %v1243_v17 = vpack.c.bf16 %v955_v15, %v954_v13 }
 0x2bf   : > { %1250 = vst [vmem:[#allocation2 + $0x30] sm:$0xff] %v1238_v16  }
 0x2c0   : > { %1251 = vst [vmem:[#allocation2 + $0x38] sm:$0xff] %v1243_v17  }
 0x2c1 PF: > { %p1183_p6 = scmp.ne.s32.totalorder %s1501_s22, 2 }
 0x2c3   : > { %1039 = sbr.rel (%p1183_p6) target bundleno = 720 (0x2d0), region = 56 }
 0x2c8   : > { %1040 = vst [vmem:[%s1691_s6] sm:$0xff] %v1618_v29  ;;  %1041 = vst [vmem:[%s1691_s6 + $0x8] sm:$0xff] %v877_v33 }
 0x2c9   : > { %1042 = vst [vmem:[%s1691_s6 + $0x10] sm:$0xff] %v1616_v27  ;;  %1043 = vst [vmem:[%s1691_s6 + $0x18] sm:$0xff] %v1620_v31 }
 0x2ca   : > { %1044 = vst [vmem:[%s1691_s6 + $0x20] sm:$0xff] %v890_v37  ;;  %1045 = vst [vmem:[%s1691_s6 + $0x28] sm:$0xff] %v893_v41 }
 0x2cb   : > { %1046 = vst [vmem:[%s1691_s6 + $0x30] sm:$0xff] %v1622_v35  ;;  %1047 = vst [vmem:[%s1691_s6 + $0x38] sm:$0xff] %v901_v39 }
 0x2cc   : > { %1048 = vst [vmem:[%s1691_s6 + $0x40] sm:$0xff] %v906_v45  ;;  %1049 = vst [vmem:[%s1691_s6 + $0x48] sm:$0xff] %v909_v49 }
 0x2cd   : > { %1050 = vst [vmem:[%s1691_s6 + $0x50] sm:$0xff] %v914_v43  ;;  %1051 = vst [vmem:[%s1691_s6 + $0x58] sm:$0xff] %v917_v47 }
 0x2ce   : > { %1052 = vst [vmem:[%s1691_s6 + $0x60] sm:$0xff] %v922_v53  ;;  %1053 = vst [vmem:[%s1691_s6 + $0x68] sm:$0xff] %v925_v57 }
 0x2cf   : > { %1054 = vst [vmem:[%s1691_s6 + $0x70] sm:$0xff] %v930_v51  ;;  %1055 = vst [vmem:[%s1691_s6 + $0x78] sm:$0xff] %v933_v55 }
 0x2d0 PF: > { %s16_s21 = sadd.s32 1, %s1458_s21  }
 0x2d1   : > { %p13_p7 = scmp.ge.s32.totalorder %s16_s21, 5  }
 0x2d3   :  { %15 = sbr.rel (!%p13_p7) target bundleno = 1 (0x1), region = 91 }

</bundles_post_ra>
